<compile_context>
chip_gen: v7x
topology: tpu7x:2x2x1
jax: 0.10.0
libtpu: 0.0.40
codegen_flags: <defaults>
</compile_context>

<pallas_src>
import functools

import jax
import jax.numpy as jnp
from jax.experimental import pallas as pl
from jax.experimental.pallas import tpu as pltpu

_MiB = 1024 * 1024
_LANE = 128


def _layernorm_kernel(x_ref, scale_ref, shift_ref, o_ref, *, eps, valid_dim,
                      affine_bf16):
    # x_ref: (block_rows, emb_pad) tile; scale_ref/shift_ref: (1, emb_pad).
    x = x_ref[...].astype(jnp.float32)
    dpad = x.shape[-1]
    inv_d = 1.0 / float(valid_dim)

    # Padded lanes are zero on input, so the sum (and hence the mean over the
    # TRUE emb_dim) is unaffected; the centered value must be masked before
    # the variance reduction.
    mean = jnp.sum(x, axis=-1, keepdims=True) * inv_d
    xc = x - mean
    if valid_dim != dpad:
        lane = jax.lax.broadcasted_iota(jnp.int32, x.shape, 1)
        xc = jnp.where(lane < valid_dim, xc, 0.0)
    var = jnp.sum(xc * xc, axis=-1, keepdims=True) * inv_d   # population variance
    inv_std = jax.lax.rsqrt(var + eps)

    if affine_bf16:
        # Reductions in f32 above; affine tail in packed bf16 (v6e/v7x VALU).
        norm = (xc * inv_std).astype(jnp.bfloat16)
        out = (norm * scale_ref[...].astype(jnp.bfloat16)
               + shift_ref[...].astype(jnp.bfloat16))
    else:
        out = (scale_ref[...].astype(jnp.float32) * (xc * inv_std)
               + shift_ref[...].astype(jnp.float32))
    o_ref[...] = out.astype(o_ref.dtype)


def _tpu_generation():
    """Returns (vmem_bytes_per_core, num_tensorcores, has_bf16_valu)."""
    vmem = 64 * _MiB  # conservative fallback (v7x per-TC)
    try:
        vmem = int(pltpu.get_tpu_info().vmem_capacity_bytes)
    except Exception:
        pass
    kind = ""
    try:
        kind = jax.devices()[0].device_kind.lower()
    except Exception:
        pass
    is_v5e = ("v5 lite" in kind) or ("v5e" in kind) or ("v5litepod" in kind)
    is_v7 = "v7" in kind
    if is_v7:
        # Defensive: if capacity is reported per-chip, clamp to per-TC 64 MiB.
        vmem = min(vmem, 64 * _MiB)
    num_cores = 2 if is_v7 else 1
    has_bf16_valu = not is_v5e
    return vmem, num_cores, has_bf16_valu


def _choose_block_rows(rows, emb_pad, in_itemsize, out_itemsize, vmem_bytes,
                       num_cores):
    # Sublane packing multiple for the input dtype: 8 (f32), 16 (bf16), 32 (i8/fp8).
    sub = max(8, 32 // max(in_itemsize, 1))

    # Per-row VMEM footprint:
    #   2x double-buffered input + 2x double-buffered output tiles,
    #   ~4 f32-sized intermediates inside the body (upcast x, xc, temps, out).
    bytes_per_row = emb_pad * (2 * in_itemsize + 2 * out_itemsize + 4 * 4)
    usable = int(vmem_bytes * 0.75)  # headroom for compiler scratch / sems
    vmem_rows = max(sub, usable // max(bytes_per_row, 1))

    # Byte target for the input tile: ~8 MiB (amortizes ~0.35 us/step overhead,
    # well above the ~2 MiB knee where tiled elementwise hits ~85% of roofline).
    target_rows = max(sub, (8 * _MiB) // max(emb_pad * in_itemsize, 1))

    block_rows = min(vmem_rows, target_rows)

    # Never taller than the (sublane-rounded) total row count.
    rows_up = ((rows + sub - 1) // sub) * sub
    block_rows = min(block_rows, rows_up)
    block_rows = max(sub, (block_rows // sub) * sub)

    # Grid-step targeting.
    min_tile_rows = max(sub, (2 * _MiB) // max(emb_pad * in_itemsize, 1))
    desired_steps = 4 if num_cores >= 2 else 2
    steps = -(-rows // block_rows)
    if steps < desired_steps and rows > desired_steps * sub:
        candidate = -(-rows // desired_steps)
        candidate = ((candidate + sub - 1) // sub) * sub
        # On 2-TC chips always split (core parallelism beats tile size); on
        # 1-TC chips only split if tiles stay above the ~2 MiB floor.
        if num_cores >= 2 or candidate >= min_tile_rows:
            block_rows = max(sub, min(block_rows, candidate))

    # On 2-TC chips prefer an even step count for load balance.
    if num_cores >= 2:
        steps = -(-rows // block_rows)
        if steps > 1 and steps % 2 == 1:
            candidate = -(-rows // (steps + 1))
            candidate = ((candidate + sub - 1) // sub) * sub
            if candidate >= sub:
                block_rows = candidate

    return max(sub, (block_rows // sub) * sub)


def layer_norm(x, scale, shift, *, eps=1e-5, block_rows=None):
    """LayerNorm over the last dim of x (matches the torch LayerNorm module).

    x:     (..., emb_dim)
    scale: (emb_dim,)
    shift: (emb_dim,)
    """
    orig_shape = x.shape
    emb_dim = orig_shape[-1]
    rows = 1
    for d in orig_shape[:-1]:
        rows *= int(d)

    # Lane-dense layout: pad the feature dim to a multiple of 128.
    emb_pad = ((emb_dim + _LANE - 1) // _LANE) * _LANE
    pad = emb_pad - emb_dim

    x2 = x.reshape(rows, emb_dim)
    scale2 = scale.reshape(1, emb_dim)
    shift2 = shift.reshape(1, emb_dim)
    if pad:
        x2 = jnp.pad(x2, ((0, 0), (0, pad)))
        scale2 = jnp.pad(scale2, ((0, 0), (0, pad)))
        shift2 = jnp.pad(shift2, ((0, 0), (0, pad)))

    in_itemsize = jnp.dtype(x.dtype).itemsize
    out_dtype = x.dtype
    out_itemsize = jnp.dtype(out_dtype).itemsize

    vmem_bytes, num_cores, has_bf16_valu = _tpu_generation()
    if block_rows is None:
        block_rows = _choose_block_rows(rows, emb_pad, in_itemsize,
                                        out_itemsize, vmem_bytes, num_cores)

    affine_bf16 = bool(has_bf16_valu and x.dtype == jnp.bfloat16)

    grid = (pl.cdiv(rows, block_rows),)

    # Scoped VMEM: double-buffered in/out tiles + f32 intermediates + params.
    tile_elems = block_rows * emb_pad
    vmem_limit = 2 * tile_elems * in_itemsize          # input, double-buffered
    vmem_limit += 2 * tile_elems * out_itemsize        # output, double-buffered
    vmem_limit += 4 * tile_elems * 4                   # f32 intermediates
    vmem_limit += 4 * emb_pad * 4 + 2 * _MiB           # scale/shift + slack
    cap = vmem_bytes - max(8 * _MiB, vmem_bytes // 8)  # 56 MiB on 64 MiB parts
    vmem_limit = int(min(max(vmem_limit, 16 * _MiB), cap))

    cost = pl.CostEstimate(
        flops=8 * rows * emb_dim,
        transcendentals=rows,
        bytes_accessed=(rows * emb_pad * (in_itemsize + out_itemsize)
                        + 2 * emb_pad * 4),
    )

    out = pl.pallas_call(
        functools.partial(_layernorm_kernel, eps=eps, valid_dim=emb_dim,
                          affine_bf16=affine_bf16),
        out_shape=jax.ShapeDtypeStruct((rows, emb_pad), out_dtype),
        grid_spec=pltpu.PrefetchScalarGridSpec(
            num_scalar_prefetch=0,
            grid=grid,
            in_specs=[
                pl.BlockSpec((block_rows, emb_pad), lambda i: (i, 0)),
                pl.BlockSpec((1, emb_pad), lambda i: (0, 0)),
                pl.BlockSpec((1, emb_pad), lambda i: (0, 0)),
            ],
            out_specs=pl.BlockSpec((block_rows, emb_pad), lambda i: (i, 0)),
        ),
        compiler_params=pltpu.CompilerParams(
            dimension_semantics=("parallel",),
            vmem_limit_bytes=vmem_limit,
        ),
        cost_estimate=cost,
    )(x2, scale2, shift2)

    if pad:
        out = out[:, :emb_dim]
    return out.reshape(orig_shape)


def _reference(x, scale, shift, eps=1e-5):
    mean = jnp.mean(x, axis=-1, keepdims=True)
    var = jnp.mean((x - mean) ** 2, axis=-1, keepdims=True)
    return scale * ((x - mean) / jnp.sqrt(var + eps)) + shift


if __name__ == "__main__":
    key = jax.random.PRNGKey(0)

    # --- primary check: shapes matching the module's typical use ---
    batch, seq, emb_dim = 2, 8, 32
    x = jax.random.normal(key, (batch, seq, emb_dim), dtype=jnp.float32)
    scale = jnp.ones((emb_dim,), dtype=jnp.float32)
    shift = jnp.zeros((emb_dim,), dtype=jnp.float32)

    out = layer_norm(x, scale, shift)
    out = jax.block_until_ready(out)
    ref = _reference(x, scale, shift)
    assert jnp.allclose(out, ref, atol=1e-5, rtol=1e-5), "mismatch vs reference"

    # --- secondary check: ragged row blocks + non-128 feature dim (masked
    #     writeback and lane-padding paths) ---
    k2 = jax.random.PRNGKey(0)
    b2, s2, d2 = 2, 13, 160          # rows=26, emb_dim not a multiple of 128
    x2 = jax.random.normal(k2, (b2, s2, d2), dtype=jnp.float32)
    scale2 = jnp.ones((d2,), dtype=jnp.float32)
    shift2 = jnp.zeros((d2,), dtype=jnp.float32)
    out2 = layer_norm(x2, scale2, shift2, block_rows=8)  # 4 steps, last ragged
    out2 = jax.block_until_ready(out2)
    ref2 = _reference(x2, scale2, shift2)
    assert jnp.allclose(out2, ref2, atol=2e-5, rtol=2e-5), "ragged/pad mismatch"

    print("KERNEL_OK")
</pallas_src>

<mosaic_0001>
module attributes {stable_mosaic.version = 11 : i64} {
  func.func @_layernorm_kernel(%arg0: i32, %arg1: memref<16x128xf32, #tpu.memory_space<vmem>>, %arg2: memref<1x128xf32, #tpu.memory_space<vmem>>, %arg3: memref<1x128xf32, #tpu.memory_space<vmem>>, %arg4: memref<16x128xf32, #tpu.memory_space<vmem>>) attributes {dimension_semantics = [#tpu.dimension_semantics<parallel>], iteration_bounds = array<i64: 1>, scalar_prefetch = 0 : i64, scratch_operands = 0 : i64, tpu.core_type = #tpu.core_type<tc>, window_params = [{transform_indices = @transform_0, window_bounds = array<i64: 16, 128>}, {pipeline_mode = #tpu.pipeline_mode<synchronous>, transform_indices = @transform_1, window_bounds = array<i64: 1, 128>}, {pipeline_mode = #tpu.pipeline_mode<synchronous>, transform_indices = @transform_2, window_bounds = array<i64: 1, 128>}, {transform_indices = @transform_3, window_bounds = array<i64: 16, 128>}]} {
    %c0 = arith.constant 0 : index
    %c0_0 = arith.constant 0 : index
    %0 = vector.load %arg1[%c0, %c0_0] : memref<16x128xf32, #tpu.memory_space<vmem>>, vector<16x128xf32>
    %cst = arith.constant dense<0.000000e+00> : vector<16xf32>
    %1 = vector.multi_reduction <add>, %0, %cst [1] : vector<16x128xf32> to vector<16xf32>
    %2 = vector.shape_cast %1 : vector<16xf32> to vector<16x1xf32>
    %cst_1 = arith.constant 3.125000e-02 : f32
    %3 = vector.broadcast %cst_1 : f32 to vector<16x1xf32>
    %4 = arith.mulf %2, %3 : vector<16x1xf32>
    %5 = vector.broadcast %4 : vector<16x1xf32> to vector<16x128xf32>
    %6 = arith.subf %0, %5 : vector<16x128xf32>
    %7 = tpu.iota {dimensions = array<i32: 1>} : vector<16x128xi32>
    %c32_i32 = arith.constant 32 : i32
    %8 = vector.broadcast %c32_i32 : i32 to vector<16x128xi32>
    %9 = arith.cmpi slt, %7, %8 : vector<16x128xi32>
    %cst_2 = arith.constant 0.000000e+00 : f32
    %10 = vector.broadcast %cst_2 : f32 to vector<16x128xf32>
    %11 = arith.select %9, %6, %10 : vector<16x128xi1>, vector<16x128xf32>
    %12 = arith.mulf %11, %11 : vector<16x128xf32>
    %cst_3 = arith.constant dense<0.000000e+00> : vector<16xf32>
    %13 = vector.multi_reduction <add>, %12, %cst_3 [1] : vector<16x128xf32> to vector<16xf32>
    %14 = vector.shape_cast %13 : vector<16xf32> to vector<16x1xf32>
    %cst_4 = arith.constant 3.125000e-02 : f32
    %15 = vector.broadcast %cst_4 : f32 to vector<16x1xf32>
    %16 = arith.mulf %14, %15 : vector<16x1xf32>
    %cst_5 = arith.constant 9.99999974E-6 : f32
    %17 = vector.broadcast %cst_5 : f32 to vector<16x1xf32>
    %18 = arith.addf %16, %17 : vector<16x1xf32>
    %19 = math.rsqrt %18 : vector<16x1xf32>
    %c0_6 = arith.constant 0 : index
    %c0_7 = arith.constant 0 : index
    %20 = vector.load %arg2[%c0_6, %c0_7] : memref<1x128xf32, #tpu.memory_space<vmem>>, vector<1x128xf32>
    %21 = vector.broadcast %19 : vector<16x1xf32> to vector<16x128xf32>
    %22 = arith.mulf %11, %21 : vector<16x128xf32>
    %23 = vector.broadcast %20 : vector<1x128xf32> to vector<16x128xf32>
    %24 = arith.mulf %23, %22 : vector<16x128xf32>
    %c0_8 = arith.constant 0 : index
    %c0_9 = arith.constant 0 : index
    %25 = vector.load %arg3[%c0_8, %c0_9] : memref<1x128xf32, #tpu.memory_space<vmem>>, vector<1x128xf32>
    %26 = vector.broadcast %25 : vector<1x128xf32> to vector<16x128xf32>
    %27 = arith.addf %24, %26 : vector<16x128xf32>
    %c0_10 = arith.constant 0 : index
    %c0_11 = arith.constant 0 : index
    %28 = vector.load %arg4[%c0_10, %c0_11] : memref<16x128xf32, #tpu.memory_space<vmem>>, vector<16x128xf32>
    tpu.vector_store %arg4[%c0_10, %c0_11], %27 {strides = array<i32>} : memref<16x128xf32, #tpu.memory_space<vmem>>, vector<16x128xf32>,
    return
  }
  func.func @transform_0(%arg0: i32) -> (i32, i32) {
    %c0_i32 = arith.constant 0 : i32
    %c0_i32_0 = arith.constant 0 : i32
    return %arg0, %c0_i32 : i32, i32
  }
  func.func @transform_1(%arg0: i32) -> (i32, i32) {
    %c0_i32 = arith.constant 0 : i32
    %c0_i32_0 = arith.constant 0 : i32
    %c0_i32_1 = arith.constant 0 : i32
    return %c0_i32, %c0_i32_0 : i32, i32
  }
  func.func @transform_2(%arg0: i32) -> (i32, i32) {
    %c0_i32 = arith.constant 0 : i32
    %c0_i32_0 = arith.constant 0 : i32
    %c0_i32_1 = arith.constant 0 : i32
    return %c0_i32, %c0_i32_0 : i32, i32
  }
  func.func @transform_3(%arg0: i32) -> (i32, i32) {
    %c0_i32 = arith.constant 0 : i32
    %c0_i32_0 = arith.constant 0 : i32
    return %arg0, %c0_i32 : i32, i32
  }
}

</mosaic_0001>

<bundles_post_ra>
// kernel: tpu_custom_call.1
= control target key start
LH: loop header
LB: loop body
LE: loop exit
PB: predicated region body
PF: predicated region fallthrough
CT: control target
= control target key end

     0   :  { %8 = vsyncpa [#allocation3], 0  ;;  %s213_s0 = inlined_call_operand.hbm [shape: f32[16,128], index: 0, kind: input, shape index: {}]   ;;  %s214_s1 = inlined_call_operand.vmem [shape: f32[1,128], index: 1, kind: input, shape index: {}]   ;;  %s215_s2 = inlined_call_operand.vmem [shape: f32[1,128], index: 2, kind: input, shape index: {}]   ;;  %s216_s3 = inlined_call_operand.hbm [shape: f32[16,128], index: 3, kind: output, shape index: {}]  }
   0x1   :  { %9 = vsyncpa [#allocation4], 0  ;;  %s153_s12 = smov [#allocation2]   ;;  %s105_s16 = scalar_lea.hbm %s213_s0, 256 }
   0x2   :  { %s15_s13 = sshll.u32 %s153_s12, 4  ;;  %p106_p0 = scmp.ne.s32.totalorder %s213_s0, %s105_s16  ;;  %s16_s13 = int_to_ptr.vmem [resolvable:$true] %s15_s13 }
   0x3   :  { %p109_p1 = scmp.lt.u32.totalorder %s105_s16, %s213_s0 }
   0x5   :  { %p111_p2 = pnand %p109_p1, %p106_p0 }
   0x7   :  { %114 = shalt.err (!%p111_p2)
}
   0x8   :  { %s115_s21 = scalar_lea.vmem %s16_s13, 256  ;;  %p120_p4 = scmp.lt.s32.totalorder %s16_s13, %s16_s13 }
   0x9   :  { %p116_p3 = scmp.ne.s32.totalorder %s16_s13, %s115_s21  ;;  %p121_p5 = scmp.lt.s32.totalorder %s115_s21, %s115_s21 }
   0xb   :  { %p122_p6 = por %p121_p5, %p120_p4 }
   0xd   :  { %p123_p7 = pnand %p122_p6, %p116_p3 }
   0xf   :  { %126 = shalt.err (!%p123_p7)
}
  0x10   :  { %s154_s22 = smov 128   ;;  %s155_s23 = smov 8  }
  0x11   :  { %21 = dma.hbm_to_vmem [thread:$0]  %s213_s0, 256, %s16_s13, [#allocation3], %s154_s22, %s154_s22, %s155_s23  }
  0x12   :  { %149 = dma.done.wait [#allocation3], 256  }
  0x13   :  { %150 = vsyncadd [#allocation3], 4294967040  ;;  %v29_v0 = vld [vmem:[#allocation2] sm:$0xff]  ;;  %v30_v1 = vld [vmem:[#allocation2 + $0x8] sm:$0xff]  ;;  %v39_v2 = vlaneseq  ;;  %s156_s29 = smov [#allocation5]  }
  0x14   :  { %31 = vadd.xlane.f32.xlu0 %v29_v0  ;;  %v95_v21 = vld [vmem:[%s214_s1] ss:$0 sm:$0xff]  ;;  %s83_s30 = sshll.u32 %s156_s29, 4  ;;  %s84_s30 = int_to_ptr.vmem [resolvable:$true] %s83_s30 }
  0x15   :  { %v40_v3 = vand.u32 127, %v39_v2  ;;  %v96_v23 = vld [vmem:[%s215_s2] ss:$0 sm:$0xff]  ;;  %s127_s4 = scalar_lea.vmem %s84_s30, 256  ;;  %p132_p9 = scmp.lt.s32.totalorder %s84_s30, %s84_s30 }
  0x16   :  { %p128_p8 = scmp.ne.s32.totalorder %s84_s30, %s127_s4  ;;  %p133_p10 = scmp.lt.s32.totalorder %s127_s4, %s127_s4 }
  0x17   :  { %vm41_vm0 = vcmp.lt.s32.totalorder %v40_v3, 32 }
  0x18   :  { %33 = vadd.xlane.f32.xlu0 %v30_v1  ;;  %p134_p11 = por %p133_p10, %p132_p9 }
  0x1a   :  { %p135_p12 = pnand %p134_p11, %p128_p8 }
  0xa1   :  { %v32_v4 = vpop.xlane.xlu0 %31 }
  0xa2   :  { %v35_v5 = vmul.f32 0.03125, %v32_v4 }
  0xa4   :  { %v37_v6 = vsub.f32 %v29_v0, %v35_v5 }
  0xa5   :  { %v34_v7 = vpop.xlane.xlu0 %33 }
  0xa6   :  { %v36_v8 = vmul.f32 0.03125, %v34_v7  ;;  %v42_v9 = vsel %vm41_vm0, %v37_v6, 0.0 }
  0xa7   :  { %v44_v10 = vmul.f32 %v42_v9, %v42_v9 }
  0xa8   :  { %v38_v11 = vsub.f32 %v30_v1, %v36_v8 }
  0xa9   :  { %46 = vadd.xlane.f32.xlu1 %v44_v10 }
  0xaa   :  { %v43_v12 = vsel %vm41_vm0, %v38_v11, 0.0 }
  0xab   :  { %v45_v13 = vmul.f32 %v43_v12, %v43_v12 }
  0xad   :  { %48 = vadd.xlane.f32.xlu1 %v45_v13 }
 0x136   :  { %v47_v14 = vpop.xlane.xlu1 %46 }
 0x137   :  { %v50_v15 = vmul.f32 0.03125, %v47_v14 }
 0x139   :  { %v52_v16 = vadd.f32 1e-05, %v50_v15 }
 0x13a   :  { %v49_v17 = vpop.xlane.xlu1 %48 }
 0x13b   :  { %101 = vrsqrt.f32 %v52_v16  ;;  %v51_v18 = vmul.f32 0.03125, %v49_v17 }
 0x13d   :  { %v53_v19 = vadd.f32 1e-05, %v51_v18 }
 0x13f   :  { %103 = vrsqrt.f32 %v53_v19 }
 0x145   :  { %v102_v20 = vpop.eup %101 }
 0x146   :  { %v57_v22 = vmul.f32 %v102_v20, %v42_v9 }
 0x148   :  { %v65_v24 = vmul.f32 %v95_v21, %v57_v22 }
 0x149   :  { %v104_v25 = vpop.eup %103 }
 0x14a   :  { %v58_v26 = vmul.f32 %v104_v25, %v43_v12  ;;  %v74_v27 = vadd.f32 %v96_v23, %v65_v24 }
 0x14c   :  { %v66_v28 = vmul.f32 %v95_v21, %v58_v26  ;;  %76 = vst [vmem:[#allocation5] sm:$0xff] %v74_v27 }
 0x14e   :  { %v75_v29 = vadd.f32 %v96_v23, %v66_v28 }
 0x150   :  { %77 = vst [vmem:[#allocation5 + $0x8] sm:$0xff] %v75_v29 }
 0x151   :  { %138 = shalt.err (!%p135_p12)
}
 0x152   :  { %s139_s5 = scalar_lea.hbm %s216_s3, 256 }
 0x153   :  { %p140_p13 = scmp.ne.s32.totalorder %s216_s3, %s139_s5  ;;  %p143_p0 = scmp.lt.u32.totalorder %s139_s5, %s216_s3 }
 0x155   :  { %p145_p1 = pnand %p143_p0, %p140_p13 }
 0x157   :  { %148 = shalt.err (!%p145_p1)
}
 0x158   :  { %89 = dma.vmem_to_hbm [thread:$0]  %s84_s30, 256, %s216_s3, [#allocation4], %s154_s22, %s154_s22, %s155_s23  }
 0x159   :  { %151 = dma.done.wait [#allocation4], 256  }
 0x15a   :  { %152 = vsyncadd [#allocation4], 4294967040 }
 0x15b   :  { %93 = vsyncpa [#allocation3], 1 }
 0x15c   :  { %94 = vsyncpa [#allocation4], 1 }

</bundles_post_ra>
